<compile_context>
chip_gen: v7x
topology: tpu7x:2x2x1
jax: 0.10.0
libtpu: 0.0.40
codegen_flags: <defaults>
</compile_context>

<pallas_src>
import jax
import jax.numpy as jnp
from jax import lax
from jax.experimental import pallas as pl
from jax.experimental.pallas import tpu as pltpu

K = 3       # depthwise kernel size (padding = 1 -> 'same')
PADW = 8    # sublane-aligned zero-border width in the staging scratch


def _pick_tile_h(H, W, Cin, Cout, itemsize=4, budget_bytes=4 << 20):
    """Largest H-tile (multiple of 8, dividing H) whose per-step working set
    (staged halo window + double-buffered output tile) fits `budget_bytes`.
    Budget is sized conservatively for v7x's 64 MiB VMEM (32 MiB scoped
    default); prefers >=2 tiles along H so the parallel spatial axis can feed
    both TensorCores on v7x."""
    divisors = [th for th in range(8, H + 1, 8) if H % th == 0]
    if not divisors:
        return H

    def step_bytes(th):
        return ((th + 2) * (W + 2 * PADW) * Cin + 2 * th * W * Cout) * itemsize

    fitting = [th for th in divisors if step_bytes(th) <= budget_bytes] or [divisors[0]]
    th = fitting[-1]
    if th == H and len(fitting) > 1:
        th = fitting[-2]          # keep >=2 spatial tiles when possible
    return th


def dwsep_fused_kernel(xp_ref, wtap_ref, bias_ref, o_ref, xw_ref):
    """Grid = (batch, H-tile).

    xp_ref  : (1, H+2, W, Cin)          H-halo-padded NHWC image, resident per batch
    wtap_ref: (K*K, Cin, Cout)          per-tap fused weights diag(w_dw[:,t]) @ W_pw
    bias_ref: (1, Cout)                 fused bias  b_dw @ W_pw + b_pw
    o_ref   : (1, TH, W, Cout)          output tile
    xw_ref  : (TH+2, W+2*PADW, Cin) f32 staging scratch with zero W borders
    """
    TH, W, Cout = o_ref.shape[1], o_ref.shape[2], o_ref.shape[3]
    Cin = xp_ref.shape[3]
    j = pl.program_id(1)

    # Stage this tile's (TH+2)-row halo window once into the W-zero-padded f32
    # scratch (one load of the pipelined input + aligned stores). Borders are
    # re-zeroed every step so the kernel is megacore-safe.
    row0 = pl.multiple_of(j * TH, TH)
    zpad = jnp.zeros((TH + 2, PADW, Cin), jnp.float32)
    xw_ref[:, 0:PADW, :] = zpad                                   # left zero border
    xw_ref[:, PADW + W:2 * PADW + W, :] = zpad                    # right zero border
    xw_ref[:, PADW:PADW + W, :] = xp_ref[0, pl.ds(row0, TH + 2), :, :].astype(jnp.float32)

    # Depthwise + pointwise fused as 9 accumulating MXU matmuls:
    #   acc += shifted_window(tap) @ (diag(w_dw[:, tap]) @ W_pw)
    acc = jnp.zeros((TH * W, Cout), jnp.float32)
    for kh in range(K):
        for kw in range(K):
            col0 = PADW - 1 + kw                                  # kw-1 shift in W
            lhs = xw_ref[kh:kh + TH, col0:col0 + W, :]            # (TH, W, Cin)
            acc = acc + jnp.dot(lhs.reshape(TH * W, Cin),         # leading-dim merge
                                wtap_ref[kh * K + kw, :, :],
                                preferred_element_type=jnp.float32)

    acc = acc + bias_ref[0, :].astype(jnp.float32)                # fused bias
    o_ref[...] = acc.reshape(1, TH, W, Cout).astype(o_ref.dtype)


def dw_conv2d_pallas(x_nchw, w_dw, b_dw, w_pw, b_pw, *, tile_h=None):
    """x_nchw: (B, Cin, H, W). Params in PyTorch conventions:
       w_dw: (Cin, 1, K, K), b_dw: (Cin,), w_pw: (Cout, Cin, 1, 1), b_pw: (Cout,)."""
    B, Cin, H, W = x_nchw.shape
    Cout = w_pw.shape[0]

    TH = tile_h if tile_h is not None else _pick_tile_h(H, W, Cin, Cout)
    assert H % TH == 0, (H, TH)
    n_th = H // TH

    # NHWC (channels -> lanes). Pad H only (1 halo row each side; fuses with the
    # transpose copy). The W border is handled inside the kernel.
    x_nhwc = jnp.transpose(x_nchw, (0, 2, 3, 1))
    x_hpad = jnp.pad(x_nhwc, ((0, 0), (1, 1), (0, 0), (0, 0)))

    # Fold the depthwise conv into the pointwise matmul (exact, linearity):
    #   W_tap[t] = diag(w_dw[:, t]) @ W_pw   -> (K*K, Cin, Cout)
    #   b_fused  = b_dw @ W_pw + b_pw        -> (1, Cout)
    wpw_t = jnp.transpose(w_pw[:, :, 0, 0], (1, 0))               # (Cin, Cout)
    wdw_taps = w_dw[:, 0, :, :].reshape(Cin, K * K)               # (Cin, K*K)
    w_tap = jnp.transpose(wdw_taps, (1, 0))[:, :, None] * wpw_t[None, :, :]
    b_fused = (jnp.dot(b_dw, wpw_t, precision=lax.Precision.HIGHEST)
               + b_pw).reshape(1, Cout).astype(jnp.float32)

    out_nhwc = pl.pallas_call(
        dwsep_fused_kernel,
        out_shape=jax.ShapeDtypeStruct((B, H, W, Cout), x_nchw.dtype),
        grid_spec=pltpu.PrefetchScalarGridSpec(
            num_scalar_prefetch=0,
            grid=(B, n_th),
            in_specs=[
                # Per-batch image stays resident across the H-tile axis (index
                # map constant in j); kernel slices its (TH+2)-row halo window.
                # TODO(synk): for very large H*W the input itself should be
                # halo-tiled (pl.Element / manual DMA) instead of per-batch resident.
                pl.BlockSpec((1, H + 2, W, Cin), lambda b, j: (b, 0, 0, 0)),
                pl.BlockSpec((K * K, Cin, Cout), lambda b, j: (0, 0, 0)),
                pl.BlockSpec((1, Cout), lambda b, j: (0, 0)),
            ],
            out_specs=pl.BlockSpec((1, TH, W, Cout), lambda b, j: (b, j, 0, 0)),
            scratch_shapes=[pltpu.VMEM((TH + 2, W + 2 * PADW, Cin), jnp.float32)],
        ),
        compiler_params=pltpu.CompilerParams(
            dimension_semantics=("parallel", "parallel")),
    )(x_hpad, w_tap, b_fused)

    # Back to NCHW to match the PyTorch module.
    return jnp.transpose(out_nhwc, (0, 3, 1, 2))


def dw_conv2d_reference(x_nchw, w_dw, b_dw, w_pw, b_pw):
    """Pure-JAX reference (lax conv) used for a correctness check."""
    Cin = x_nchw.shape[1]
    x_nhwc = jnp.transpose(x_nchw, (0, 2, 3, 1))
    w_dw_hwio = jnp.transpose(w_dw, (2, 3, 1, 0))                 # (K, K, 1, Cin)
    dw = lax.conv_general_dilated(
        x_nhwc, w_dw_hwio, (1, 1), 'SAME',
        dimension_numbers=('NHWC', 'HWIO', 'NHWC'),
        feature_group_count=Cin,
        precision=lax.Precision.HIGHEST)
    dw = dw + b_dw.reshape(1, 1, 1, -1)
    pw = jnp.einsum('bhwc,oc->bhwo', dw, w_pw[:, :, 0, 0],
                    precision=lax.Precision.HIGHEST) + b_pw.reshape(1, 1, 1, -1)
    return jnp.transpose(pw, (0, 3, 1, 2))


if __name__ == "__main__":
    B, Cin, Cout, H, W = 2, 4, 8, 16, 16

    key = jax.random.PRNGKey(0)
    kx, k1, k2, k3, k4 = jax.random.split(key, 5)
    x = jax.random.normal(kx, (B, Cin, H, W), dtype=jnp.float32)
    # Deterministic parameter init (synthetic; shapes follow nn.Conv2d conventions).
    w_dw = jax.random.normal(k1, (Cin, 1, K, K), dtype=jnp.float32) * 0.1
    b_dw = jax.random.normal(k2, (Cin,), dtype=jnp.float32) * 0.1
    w_pw = jax.random.normal(k3, (Cout, Cin, 1, 1), dtype=jnp.float32) * 0.1
    b_pw = jax.random.normal(k4, (Cout,), dtype=jnp.float32) * 0.1

    out = jax.block_until_ready(dw_conv2d_pallas(x, w_dw, b_dw, w_pw, b_pw))
    ref = jax.block_until_ready(dw_conv2d_reference(x, w_dw, b_dw, w_pw, b_pw))

    assert out.shape == (B, Cout, H, W), out.shape
    # Fused (9-matmul) formulation changes accumulation order slightly -> 1e-3 tol.
    assert jnp.allclose(out, ref, atol=1e-3, rtol=1e-3), \
        float(jnp.max(jnp.abs(out - ref)))

    print("KERNEL_OK")
</pallas_src>

<mosaic_0001>
module attributes {stable_mosaic.version = 11 : i64} {
  func.func @dwsep_fused_kernel(%arg0: i32, %arg1: i32, %arg2: memref<1x18x16x4xf32, #tpu.memory_space<vmem>>, %arg3: memref<9x4x8xf32, #tpu.memory_space<vmem>>, %arg4: memref<1x8xf32, #tpu.memory_space<vmem>>, %arg5: memref<1x8x16x8xf32, #tpu.memory_space<vmem>>, %arg6: memref<10x32x4xf32, #tpu.memory_space<vmem>>) attributes {dimension_semantics = [#tpu.dimension_semantics<parallel>, #tpu.dimension_semantics<parallel>], iteration_bounds = array<i64: 2, 2>, scalar_prefetch = 0 : i64, scratch_operands = 1 : i64, tpu.core_type = #tpu.core_type<tc>, window_params = [{transform_indices = @transform_0, window_bounds = array<i64: 1, 18, 16, 4>}, {pipeline_mode = #tpu.pipeline_mode<synchronous>, transform_indices = @transform_1, window_bounds = array<i64: 9, 4, 8>}, {pipeline_mode = #tpu.pipeline_mode<synchronous>, transform_indices = @transform_2, window_bounds = array<i64: 1, 8>}, {transform_indices = @transform_3, window_bounds = array<i64: 1, 8, 16, 8>}]} {
    %c8_i32 = arith.constant 8 : i32
    %0 = arith.muli %arg1, %c8_i32 : i32
    %1 = tpu.assume_multiple %0, 8 : i32
    %cst = arith.constant 0.000000e+00 : f32
    %2 = vector.broadcast %cst : f32 to vector<10x8x4xf32>
    %c0 = arith.constant 0 : index
    %c0_0 = arith.constant 0 : index
    %c0_1 = arith.constant 0 : index
    %3 = vector.load %arg6[%c0, %c0_0, %c0_1] : memref<10x32x4xf32, #tpu.memory_space<vmem>>, vector<10x8x4xf32>
    tpu.vector_store %arg6[%c0, %c0_0, %c0_1], %2 {strides = array<i32>} : memref<10x32x4xf32, #tpu.memory_space<vmem>>, vector<10x8x4xf32>,
    %c0_2 = arith.constant 0 : index
    %c24 = arith.constant 24 : index
    %c0_3 = arith.constant 0 : index
    %4 = vector.load %arg6[%c0_2, %c24, %c0_3] : memref<10x32x4xf32, #tpu.memory_space<vmem>>, vector<10x8x4xf32>
    tpu.vector_store %arg6[%c0_2, %c24, %c0_3], %2 {strides = array<i32>} : memref<10x32x4xf32, #tpu.memory_space<vmem>>, vector<10x8x4xf32>,
    %c0_4 = arith.constant 0 : index
    %5 = arith.index_cast %1 : i32 to index
    %c0_5 = arith.constant 0 : index
    %c0_6 = arith.constant 0 : index
    %6 = vector.load %arg2[%c0_4, %5, %c0_5, %c0_6] : memref<1x18x16x4xf32, #tpu.memory_space<vmem>>, vector<1x10x16x4xf32>
    %7 = vector.shape_cast %6 : vector<1x10x16x4xf32> to vector<10x16x4xf32>
    %c0_7 = arith.constant 0 : index
    %c8 = arith.constant 8 : index
    %c0_8 = arith.constant 0 : index
    %8 = vector.load %arg6[%c0_7, %c8, %c0_8] : memref<10x32x4xf32, #tpu.memory_space<vmem>>, vector<10x16x4xf32>
    tpu.vector_store %arg6[%c0_7, %c8, %c0_8], %7 {strides = array<i32>} : memref<10x32x4xf32, #tpu.memory_space<vmem>>, vector<10x16x4xf32>,
    %cst_9 = arith.constant 0.000000e+00 : f32
    %9 = vector.broadcast %cst_9 : f32 to vector<128x8xf32>
    %c0_10 = arith.constant 0 : index
    %c7 = arith.constant 7 : index
    %c0_11 = arith.constant 0 : index
    %10 = vector.load %arg6[%c0_10, %c7, %c0_11] : memref<10x32x4xf32, #tpu.memory_space<vmem>>, vector<8x16x4xf32>
    %11 = vector.shape_cast %10 : vector<8x16x4xf32> to vector<128x4xf32>
    %c0_12 = arith.constant 0 : index
    %c0_13 = arith.constant 0 : index
    %c0_14 = arith.constant 0 : index
    %12 = vector.load %arg3[%c0_12, %c0_13, %c0_14] : memref<9x4x8xf32, #tpu.memory_space<vmem>>, vector<1x4x8xf32>
    %13 = vector.shape_cast %12 : vector<1x4x8xf32> to vector<4x8xf32>
    %cst_15 = arith.constant dense<0.000000e+00> : vector<128x8xf32>
    %14 = tpu.matmul %11, %13, %cst_15 {dimension_numbers = #tpu.dot_dimension_numbers<[1], [0], [0], [1], [0, 0, 1, 1], [], []>} : vector<128x4xf32>, vector<4x8xf32>, vector<128x8xf32> -> vector<128x8xf32>
    %15 = arith.addf %9, %14 : vector<128x8xf32>
    %c0_16 = arith.constant 0 : index
    %c8_17 = arith.constant 8 : index
    %c0_18 = arith.constant 0 : index
    %16 = vector.load %arg6[%c0_16, %c8_17, %c0_18] : memref<10x32x4xf32, #tpu.memory_space<vmem>>, vector<8x16x4xf32>
    %17 = vector.shape_cast %16 : vector<8x16x4xf32> to vector<128x4xf32>
    %c1 = arith.constant 1 : index
    %c0_19 = arith.constant 0 : index
    %c0_20 = arith.constant 0 : index
    %18 = vector.load %arg3[%c1, %c0_19, %c0_20] : memref<9x4x8xf32, #tpu.memory_space<vmem>>, vector<1x4x8xf32>
    %19 = vector.shape_cast %18 : vector<1x4x8xf32> to vector<4x8xf32>
    %cst_21 = arith.constant dense<0.000000e+00> : vector<128x8xf32>
    %20 = tpu.matmul %17, %19, %cst_21 {dimension_numbers = #tpu.dot_dimension_numbers<[1], [0], [0], [1], [0, 0, 1, 1], [], []>} : vector<128x4xf32>, vector<4x8xf32>, vector<128x8xf32> -> vector<128x8xf32>
    %21 = arith.addf %15, %20 : vector<128x8xf32>
    %c0_22 = arith.constant 0 : index
    %c9 = arith.constant 9 : index
    %c0_23 = arith.constant 0 : index
    %22 = vector.load %arg6[%c0_22, %c9, %c0_23] : memref<10x32x4xf32, #tpu.memory_space<vmem>>, vector<8x16x4xf32>
    %23 = vector.shape_cast %22 : vector<8x16x4xf32> to vector<128x4xf32>
    %c2 = arith.constant 2 : index
    %c0_24 = arith.constant 0 : index
    %c0_25 = arith.constant 0 : index
    %24 = vector.load %arg3[%c2, %c0_24, %c0_25] : memref<9x4x8xf32, #tpu.memory_space<vmem>>, vector<1x4x8xf32>
    %25 = vector.shape_cast %24 : vector<1x4x8xf32> to vector<4x8xf32>
    %cst_26 = arith.constant dense<0.000000e+00> : vector<128x8xf32>
    %26 = tpu.matmul %23, %25, %cst_26 {dimension_numbers = #tpu.dot_dimension_numbers<[1], [0], [0], [1], [0, 0, 1, 1], [], []>} : vector<128x4xf32>, vector<4x8xf32>, vector<128x8xf32> -> vector<128x8xf32>
    %27 = arith.addf %21, %26 : vector<128x8xf32>
    %c1_27 = arith.constant 1 : index
    %c7_28 = arith.constant 7 : index
    %c0_29 = arith.constant 0 : index
    %28 = vector.load %arg6[%c1_27, %c7_28, %c0_29] : memref<10x32x4xf32, #tpu.memory_space<vmem>>, vector<8x16x4xf32>
    %29 = vector.shape_cast %28 : vector<8x16x4xf32> to vector<128x4xf32>
    %c3 = arith.constant 3 : index
    %c0_30 = arith.constant 0 : index
    %c0_31 = arith.constant 0 : index
    %30 = vector.load %arg3[%c3, %c0_30, %c0_31] : memref<9x4x8xf32, #tpu.memory_space<vmem>>, vector<1x4x8xf32>
    %31 = vector.shape_cast %30 : vector<1x4x8xf32> to vector<4x8xf32>
    %cst_32 = arith.constant dense<0.000000e+00> : vector<128x8xf32>
    %32 = tpu.matmul %29, %31, %cst_32 {dimension_numbers = #tpu.dot_dimension_numbers<[1], [0], [0], [1], [0, 0, 1, 1], [], []>} : vector<128x4xf32>, vector<4x8xf32>, vector<128x8xf32> -> vector<128x8xf32>
    %33 = arith.addf %27, %32 : vector<128x8xf32>
    %c1_33 = arith.constant 1 : index
    %c8_34 = arith.constant 8 : index
    %c0_35 = arith.constant 0 : index
    %34 = vector.load %arg6[%c1_33, %c8_34, %c0_35] : memref<10x32x4xf32, #tpu.memory_space<vmem>>, vector<8x16x4xf32>
    %35 = vector.shape_cast %34 : vector<8x16x4xf32> to vector<128x4xf32>
    %c4 = arith.constant 4 : index
    %c0_36 = arith.constant 0 : index
    %c0_37 = arith.constant 0 : index
    %36 = vector.load %arg3[%c4, %c0_36, %c0_37] : memref<9x4x8xf32, #tpu.memory_space<vmem>>, vector<1x4x8xf32>
    %37 = vector.shape_cast %36 : vector<1x4x8xf32> to vector<4x8xf32>
    %cst_38 = arith.constant dense<0.000000e+00> : vector<128x8xf32>
    %38 = tpu.matmul %35, %37, %cst_38 {dimension_numbers = #tpu.dot_dimension_numbers<[1], [0], [0], [1], [0, 0, 1, 1], [], []>} : vector<128x4xf32>, vector<4x8xf32>, vector<128x8xf32> -> vector<128x8xf32>
    %39 = arith.addf %33, %38 : vector<128x8xf32>
    %c1_39 = arith.constant 1 : index
    %c9_40 = arith.constant 9 : index
    %c0_41 = arith.constant 0 : index
    %40 = vector.load %arg6[%c1_39, %c9_40, %c0_41] : memref<10x32x4xf32, #tpu.memory_space<vmem>>, vector<8x16x4xf32>
    %41 = vector.shape_cast %40 : vector<8x16x4xf32> to vector<128x4xf32>
    %c5 = arith.constant 5 : index
    %c0_42 = arith.constant 0 : index
    %c0_43 = arith.constant 0 : index
    %42 = vector.load %arg3[%c5, %c0_42, %c0_43] : memref<9x4x8xf32, #tpu.memory_space<vmem>>, vector<1x4x8xf32>
    %43 = vector.shape_cast %42 : vector<1x4x8xf32> to vector<4x8xf32>
    %cst_44 = arith.constant dense<0.000000e+00> : vector<128x8xf32>
    %44 = tpu.matmul %41, %43, %cst_44 {dimension_numbers = #tpu.dot_dimension_numbers<[1], [0], [0], [1], [0, 0, 1, 1], [], []>} : vector<128x4xf32>, vector<4x8xf32>, vector<128x8xf32> -> vector<128x8xf32>
    %45 = arith.addf %39, %44 : vector<128x8xf32>
    %c2_45 = arith.constant 2 : index
    %c7_46 = arith.constant 7 : index
    %c0_47 = arith.constant 0 : index
    %46 = vector.load %arg6[%c2_45, %c7_46, %c0_47] : memref<10x32x4xf32, #tpu.memory_space<vmem>>, vector<8x16x4xf32>
    %47 = vector.shape_cast %46 : vector<8x16x4xf32> to vector<128x4xf32>
    %c6 = arith.constant 6 : index
    %c0_48 = arith.constant 0 : index
    %c0_49 = arith.constant 0 : index
    %48 = vector.load %arg3[%c6, %c0_48, %c0_49] : memref<9x4x8xf32, #tpu.memory_space<vmem>>, vector<1x4x8xf32>
    %49 = vector.shape_cast %48 : vector<1x4x8xf32> to vector<4x8xf32>
    %cst_50 = arith.constant dense<0.000000e+00> : vector<128x8xf32>
    %50 = tpu.matmul %47, %49, %cst_50 {dimension_numbers = #tpu.dot_dimension_numbers<[1], [0], [0], [1], [0, 0, 1, 1], [], []>} : vector<128x4xf32>, vector<4x8xf32>, vector<128x8xf32> -> vector<128x8xf32>
    %51 = arith.addf %45, %50 : vector<128x8xf32>
    %c2_51 = arith.constant 2 : index
    %c8_52 = arith.constant 8 : index
    %c0_53 = arith.constant 0 : index
    %52 = vector.load %arg6[%c2_51, %c8_52, %c0_53] : memref<10x32x4xf32, #tpu.memory_space<vmem>>, vector<8x16x4xf32>
    %53 = vector.shape_cast %52 : vector<8x16x4xf32> to vector<128x4xf32>
    %c7_54 = arith.constant 7 : index
    %c0_55 = arith.constant 0 : index
    %c0_56 = arith.constant 0 : index
    %54 = vector.load %arg3[%c7_54, %c0_55, %c0_56] : memref<9x4x8xf32, #tpu.memory_space<vmem>>, vector<1x4x8xf32>
    %55 = vector.shape_cast %54 : vector<1x4x8xf32> to vector<4x8xf32>
    %cst_57 = arith.constant dense<0.000000e+00> : vector<128x8xf32>
    %56 = tpu.matmul %53, %55, %cst_57 {dimension_numbers = #tpu.dot_dimension_numbers<[1], [0], [0], [1], [0, 0, 1, 1], [], []>} : vector<128x4xf32>, vector<4x8xf32>, vector<128x8xf32> -> vector<128x8xf32>
    %57 = arith.addf %51, %56 : vector<128x8xf32>
    %c2_58 = arith.constant 2 : index
    %c9_59 = arith.constant 9 : index
    %c0_60 = arith.constant 0 : index
    %58 = vector.load %arg6[%c2_58, %c9_59, %c0_60] : memref<10x32x4xf32, #tpu.memory_space<vmem>>, vector<8x16x4xf32>
    %59 = vector.shape_cast %58 : vector<8x16x4xf32> to vector<128x4xf32>
    %c8_61 = arith.constant 8 : index
    %c0_62 = arith.constant 0 : index
    %c0_63 = arith.constant 0 : index
    %60 = vector.load %arg3[%c8_61, %c0_62, %c0_63] : memref<9x4x8xf32, #tpu.memory_space<vmem>>, vector<1x4x8xf32>
    %61 = vector.shape_cast %60 : vector<1x4x8xf32> to vector<4x8xf32>
    %cst_64 = arith.constant dense<0.000000e+00> : vector<128x8xf32>
    %62 = tpu.matmul %59, %61, %cst_64 {dimension_numbers = #tpu.dot_dimension_numbers<[1], [0], [0], [1], [0, 0, 1, 1], [], []>} : vector<128x4xf32>, vector<4x8xf32>, vector<128x8xf32> -> vector<128x8xf32>
    %63 = arith.addf %57, %62 : vector<128x8xf32>
    %c0_65 = arith.constant 0 : index
    %c0_66 = arith.constant 0 : index
    %64 = vector.load %arg4[%c0_65, %c0_66] : memref<1x8xf32, #tpu.memory_space<vmem>>, vector<1x8xf32>
    %65 = vector.shape_cast %64 : vector<1x8xf32> to vector<8xf32>
    %66 = vector.shape_cast %65 : vector<8xf32> to vector<1x8xf32>
    %67 = vector.broadcast %66 : vector<1x8xf32> to vector<128x8xf32>
    %68 = arith.addf %63, %67 : vector<128x8xf32>
    %69 = vector.shape_cast %68 : vector<128x8xf32> to vector<1x8x16x8xf32>
    %c0_67 = arith.constant 0 : index
    %c0_68 = arith.constant 0 : index
    %c0_69 = arith.constant 0 : index
    %c0_70 = arith.constant 0 : index
    %70 = vector.load %arg5[%c0_67, %c0_68, %c0_69, %c0_70] : memref<1x8x16x8xf32, #tpu.memory_space<vmem>>, vector<1x8x16x8xf32>
    tpu.vector_store %arg5[%c0_67, %c0_68, %c0_69, %c0_70], %69 {strides = array<i32>} : memref<1x8x16x8xf32, #tpu.memory_space<vmem>>, vector<1x8x16x8xf32>,
    return
  }
  func.func @transform_0(%arg0: i32, %arg1: i32) -> (i32, i32, i32, i32) {
    %c0_i32 = arith.constant 0 : i32
    %c0_i32_0 = arith.constant 0 : i32
    %c0_i32_1 = arith.constant 0 : i32
    %c0_i32_2 = arith.constant 0 : i32
    return %arg0, %c0_i32, %c0_i32_0, %c0_i32_1 : i32, i32, i32, i32
  }
  func.func @transform_1(%arg0: i32, %arg1: i32) -> (i32, i32, i32) {
    %c0_i32 = arith.constant 0 : i32
    %c0_i32_0 = arith.constant 0 : i32
    %c0_i32_1 = arith.constant 0 : i32
    %c0_i32_2 = arith.constant 0 : i32
    return %c0_i32, %c0_i32_0, %c0_i32_1 : i32, i32, i32
  }
  func.func @transform_2(%arg0: i32, %arg1: i32) -> (i32, i32) {
    %c0_i32 = arith.constant 0 : i32
    %c0_i32_0 = arith.constant 0 : i32
    %c0_i32_1 = arith.constant 0 : i32
    return %c0_i32, %c0_i32_0 : i32, i32
  }
  func.func @transform_3(%arg0: i32, %arg1: i32) -> (i32, i32, i32, i32) {
    %c0_i32 = arith.constant 0 : i32
    %c0_i32_0 = arith.constant 0 : i32
    %c0_i32_1 = arith.constant 0 : i32
    return %arg0, %arg1, %c0_i32, %c0_i32_0 : i32, i32, i32, i32
  }
}

</mosaic_0001>

<bundles_post_ra>
// kernel: tpu_custom_call.1
= control target key start
LH: loop header
LB: loop body
LE: loop exit
PB: predicated region body
PF: predicated region fallthrough
CT: control target
= control target key end

     0   :  { %s3229_s12 = smov 0   ;;  %s3231_s13 = smov 0   ;;  %s3826_s0 = inlined_call_operand.vmem [shape: f32[2,18,16,4], index: 0, kind: input, shape index: {}]   ;;  %s3827_s1 = inlined_call_operand.vmem [shape: f32[9,4,8], index: 1, kind: input, shape index: {}]   ;;  %s3828_s2 = inlined_call_operand.vmem [shape: f32[1,8], index: 2, kind: input, shape index: {}]   ;;  %s3829_s3 = inlined_call_operand.vmem [shape: f32[2,16,16,8], index: 3, kind: output, shape index: {}]  }
   0x1   :  { %s3233_s14 = smov 0   ;;  %s3235_s15 = smov 0  }
   0x2   :  { %s3237_s16 = smov 0  }
   0x3 LB: > { %s22_s17 = sadd.s32 1, %s3198_s14  ;;  %s25_s18 = sadd.s32 1, %s3202_s15  ;;  %s3206_s16 = sphi %s3237_s16, %s13_s16   ;;  %s3202_s15 = sphi %s3235_s15, %s3833_s15   ;;  %s3198_s14 = sphi %s3233_s14, %s3832_s14   ;;  %s3194_s13 = sphi %s3231_s13, %s3831_s13   ;;  %s3190_s12 = sphi %s3229_s12, %s3830_s12  }
   0x4   : > { %p23_p0 = scmp.ge.s32.totalorder %s22_s17, 2  ;;  %p2436_p1 = scmp.ge.s32.totalorder %s3206_s16, 1 }
   0x5   : > { %p151_p2 = scmp.lt.s32.totalorder %s3206_s16, 5 }
   0x6   : > { %s3835_s17 = smov (%p23_p0, %s22_s17), 0  ;;  %s3837_s18 = smov (!%p23_p0, %s25_s18), %s3202_s15 }
   0x7   : > { %p152_p3 = pnand %p2436_p1, %p151_p2  ;;  %p27_p4 = scmp.ge.s32.totalorder %s3837_s18, 2 }
   0x8   : > { %v2444_v0 = vld [vmem:[%s3827_s1 + $0x4] sm:$0xf] (!%p152_p3)  ;;  %vm343_vm0 = vcmask (!%p152_p3), 1043456   ;;  %v3267_v1 = vld [vmem:[%s3827_s1 + $0x10] sm:$0xf] (!%p152_p3)  ;;  %p180_p5 = scmp.lt.s32.totalorder (!%p152_p3), %s3194_s13, 1 }
   0x9   : > { %s3839_s18 = smov (%p27_p4, %s3837_s18), 0  ;;  %155 = sbr.rel (%p152_p3) target bundleno = 391 (0x187), region = 32 }
   0xa   : > { %2762 = vmatprep.subr.msk.mxu1 (!%p152_p3), %vm343_vm0, %v2444_v0  ;;  %2866 = vmatprep.subr.msk.mxu0 (!%p152_p3), %vm343_vm0, %v3267_v1  ;;  %v3275_v2 = vld [vmem:[%s3827_s1] sm:$0xf] (!%p152_p3)  ;;  %v3280_v3 = vld [vmem:[%s3827_s1 + $0x14] sm:$0xf] (!%p152_p3)  ;;  %vm197_vm1 = vcmask (!%p152_p3), 31744   ;;  %v3208_v4 = vmov (!%p152_p3), 0.0  }
   0xb   : > { %2763 = vmatpush3.msk.msra.mxu1 (!%p152_p3), %vm343_vm0, %v2444_v0  ;;  %2867 = vmatpush3.msk.msra.mxu0 (!%p152_p3), %vm343_vm0, %v3267_v1  ;;  %209 = vst.msk [vmem:[#allocation2 + $0x38] sm:$0xff] (!%p152_p3), %vm197_vm1, %v3208_v4  ;;  %198 = vst.msk [vmem:[#allocation2] sm:$0xff] (!%p152_p3), %vm197_vm1, %v3208_v4  ;;  %s2608_s28 = sshll.u32 (!%p152_p3), %s3190_s12, 7  ;;  %v2551_v30 = vld [vmem:[%s3827_s1 + $0x18] sm:$0xf] (!%p152_p3)  ;;  %s2438_s23 = sshll.u32 (!%p152_p3), %s3190_s12, 3 }
   0xc   : > { %2788 = vmatprep.subr.msk.mxu1 (!%p152_p3), %vm343_vm0, %v3275_v2  ;;  %2892 = vmatprep.subr.msk.mxu0 (!%p152_p3), %vm343_vm0, %v3280_v3  ;;  %199 = vst.msk [vmem:[#allocation2 + $0x20] sm:$0xff] (!%p152_p3), %vm197_vm1, %v3208_v4  ;;  %200 = vst.msk [vmem:[#allocation2 + $0x40] sm:$0xff] (!%p152_p3), %vm197_vm1, %v3208_v4  ;;  %v3370_v31 = vld [vmem:[%s3827_s1 + $0x8] sm:$0xf] (!%p152_p3)  ;;  %v3426_v41 = vld [vmem:[%s3827_s1 + $0x1c] sm:$0xf] (!%p152_p3) }
   0xd   : > { %201 = vst.msk [vmem:[#allocation2 + $0x60] sm:$0xff] (!%p152_p3), %vm197_vm1, %v3208_v4  ;;  %202 = vst.msk [vmem:[#allocation2 + $0x80] sm:$0xff] (!%p152_p3), %vm197_vm1, %v3208_v4  ;;  %v2497_v58 = vld [vmem:[%s3827_s1 + $0xc] sm:$0xf] (!%p152_p3)  ;;  %p188_p6 = scmp.lt.s32.totalorder (!%p152_p3), %s2438_s23, 15  ;;  %vm2323_vm2 = vcmask (!%p152_p3), 64512  }
   0xe   : > { %203 = vst.msk [vmem:[#allocation2 + $0xa0] sm:$0xff] (!%p152_p3), %vm197_vm1, %v3208_v4  ;;  %204 = vst.msk [vmem:[#allocation2 + $0xc0] sm:$0xff] (!%p152_p3), %vm197_vm1, %v3208_v4 }
   0xf   : > { %205 = vst.msk [vmem:[#allocation2 + $0xe0] sm:$0xff] (!%p152_p3), %vm197_vm1, %v3208_v4  ;;  %206 = vst.msk [vmem:[#allocation2 + $0x100] sm:$0xff] (!%p152_p3), %vm197_vm1, %v3208_v4 }
  0x10   : > { %s3841_s13 = smov (!%p180_p5, %s3194_s13), 1  ;;  %207 = vst.msk [vmem:[#allocation2 + $0x120] sm:$0xff] %vm197_vm1, %v3208_v4  ;;  %208 = vst.msk [vmem:[#allocation2 + $0x18] sm:$0xff] %vm197_vm1, %v3208_v4  ;;  %s3843_s23 = smov (!%p188_p6, %s2438_s23), 15 }
  0x11   : > { %210 = vst.msk [vmem:[#allocation2 + $0x58] sm:$0xff] %vm197_vm1, %v3208_v4  ;;  %211 = vst.msk [vmem:[#allocation2 + $0x78] sm:$0xff] %vm197_vm1, %v3208_v4  ;;  %s3126_s27 = smul.u32 288, %s3841_s13  ;;  %s2439_s24 = sshll.u32 %s3843_s23, 1 }
  0x12   : > { %212 = vst.msk [vmem:[#allocation2 + $0x98] sm:$0xff] %vm197_vm1, %v3208_v4  ;;  %213 = vst.msk [vmem:[#allocation2 + $0xb8] sm:$0xff] %vm197_vm1, %v3208_v4  ;;  %s2440_s25 = sshll.u32 %s3841_s13, 5 }
  0x13   : > { %214 = vst.msk [vmem:[#allocation2 + $0xd8] sm:$0xff] %vm197_vm1, %v3208_v4  ;;  %215 = vst.msk [vmem:[#allocation2 + $0xf8] sm:$0xff] %vm197_vm1, %v3208_v4  ;;  %s184_s4 = scalar_lea.vmem %s3826_s0, %s3126_s27  ;;  %s192_s26 = sadd.s32 %s2440_s25, %s2439_s24 }
  0x14   : > { %216 = vst.msk [vmem:[#allocation2 + $0x118] sm:$0xff] %vm197_vm1, %v3208_v4  ;;  %217 = vst.msk [vmem:[#allocation2 + $0x138] sm:$0xff] %vm197_vm1, %v3208_v4  ;;  %s3316_s5 = scalar_lea.vmem %s184_s4, %s2608_s28  ;;  %s2441_s27 = sshll.u32 %s192_s26, 3 }
  0x15   : > { %v220_v5 = vld [vmem:[%s3316_s5] sm:$0xff]  ;;  %v222_v6 = vld [vmem:[%s3316_s5 + $0x10] sm:$0xff]  ;;  %v221_v7 = vld [vmem:[%s3316_s5 + $0x8] sm:$0xff]  ;;  %s3761_s4 = scalar_lea.vmem %s3829_s3, %s2441_s27 }
  0x16   : > { %240 = vst.msk [vmem:[#allocation2 + $0x8] sm:$0xff] %vm197_vm1, %v220_v5  ;;  %242 = vst.msk [vmem:[#allocation2 + $0x28] sm:$0xff] %vm197_vm1, %v222_v6  ;;  %v223_v8 = vld [vmem:[%s3316_s5 + $0x18] sm:$0xff]  ;;  %v224_v9 = vld [vmem:[%s3316_s5 + $0x20] sm:$0xff] }
  0x17   : > { %241 = vst.msk [vmem:[#allocation2 + $0x10] sm:$0xff] %vm197_vm1, %v221_v7  ;;  %v225_v10 = vld [vmem:[%s3316_s5 + $0x28] sm:$0xff]  ;;  %243 = vst.msk [vmem:[#allocation2 + $0x30] sm:$0xff] %vm197_vm1, %v223_v8  ;;  %v226_v11 = vld [vmem:[%s3316_s5 + $0x30] sm:$0xff] }
  0x18   : > { %244 = vst.msk [vmem:[#allocation2 + $0x48] sm:$0xff] %vm197_vm1, %v224_v9  ;;  %245 = vst.msk [vmem:[#allocation2 + $0x50] sm:$0xff] %vm197_vm1, %v225_v10  ;;  %v227_v12 = vld [vmem:[%s3316_s5 + $0x38] sm:$0xff]  ;;  %v228_v13 = vld [vmem:[%s3316_s5 + $0x40] sm:$0xff] }
  0x19   : > { %246 = vst.msk [vmem:[#allocation2 + $0x68] sm:$0xff] %vm197_vm1, %v226_v11  ;;  %247 = vst.msk [vmem:[#allocation2 + $0x70] sm:$0xff] %vm197_vm1, %v227_v12  ;;  %v229_v14 = vld [vmem:[%s3316_s5 + $0x48] sm:$0xff]  ;;  %v230_v15 = vld [vmem:[%s3316_s5 + $0x50] sm:$0xff] }
  0x1a   : > { %248 = vst.msk [vmem:[#allocation2 + $0x88] sm:$0xff] %vm197_vm1, %v228_v13  ;;  %v231_v16 = vld [vmem:[%s3316_s5 + $0x58] sm:$0xff]  ;;  %249 = vst.msk [vmem:[#allocation2 + $0x90] sm:$0xff] %vm197_vm1, %v229_v14  ;;  %v232_v17 = vld [vmem:[%s3316_s5 + $0x60] sm:$0xff] }
  0x1b   : > { %250 = vst.msk [vmem:[#allocation2 + $0xa8] sm:$0xff] %vm197_vm1, %v230_v15  ;;  %251 = vst.msk [vmem:[#allocation2 + $0xb0] sm:$0xff] %vm197_vm1, %v231_v16  ;;  %v233_v18 = vld [vmem:[%s3316_s5 + $0x68] sm:$0xff]  ;;  %v234_v19 = vld [vmem:[%s3316_s5 + $0x70] sm:$0xff] }
  0x1c   : > { %252 = vst.msk [vmem:[#allocation2 + $0xc8] sm:$0xff] %vm197_vm1, %v232_v17  ;;  %253 = vst.msk [vmem:[#allocation2 + $0xd0] sm:$0xff] %vm197_vm1, %v233_v18  ;;  %v235_v20 = vld [vmem:[%s3316_s5 + $0x78] sm:$0xff]  ;;  %v236_v21 = vld [vmem:[%s3316_s5 + $0x80] sm:$0xff] }
  0x1d   : > { %254 = vst.msk [vmem:[#allocation2 + $0xe8] sm:$0xff] %vm197_vm1, %v234_v19  ;;  %v237_v22 = vld [vmem:[%s3316_s5 + $0x88] sm:$0xff]  ;;  %255 = vst.msk [vmem:[#allocation2 + $0xf0] sm:$0xff] %vm197_vm1, %v235_v20  ;;  %v238_v23 = vld [vmem:[%s3316_s5 + $0x90] sm:$0xff] }
  0x1e   : > { %256 = vst.msk [vmem:[#allocation2 + $0x108] sm:$0xff] %vm197_vm1, %v236_v21  ;;  %257 = vst.msk [vmem:[#allocation2 + $0x110] sm:$0xff] %vm197_vm1, %v237_v22  ;;  %v239_v24 = vld [vmem:[%s3316_s5 + $0x98] sm:$0xff]  ;;  %v277_v25 = vld [vmem:[#allocation2 + $0x8] sm:$0xff] }
  0x1f   : > { %258 = vst.msk [vmem:[#allocation2 + $0x128] sm:$0xff] %vm197_vm1, %v238_v23  ;;  %259 = vst.msk [vmem:[#allocation2 + $0x130] sm:$0xff] %vm197_vm1, %v239_v24  ;;  %v1149_v26 = vld [vmem:[#allocation2 + $0x28] sm:$0xff]  ;;  %v278_v27 = vld [vmem:[#allocation2 + $0x10] sm:$0xff]  ;;  %2764 = vmatprep.mubr.msk.f32.mxu1 %vm197_vm1, %v277_v25 }
  0x20   : > { %2868 = vmatprep.mubr.msk.f32.mxu0 %vm197_vm1, %v1149_v26  ;;  %v1150_v28 = vld [vmem:[#allocation2 + $0x30] sm:$0xff]  ;;  %v3360_v29 = vld [vmem:[#allocation2 + $0x48] sm:$0xff]  ;;  %2765 = vmatmul.mubr.msk.f32.vlgmr.msra.gmra.mrb[0].mxu1 %vm197_vm1, %v278_v27  ;;  %v2587_v9 = vld [vmem:[%s3827_s1 + $0x20] sm:$0xf] }
  0x21   : > { %2869 = vmatmul.mubr.msk.f32.vlgmr.msra.gmra.mrb[0].mxu0 %vm197_vm1, %v1150_v28  ;;  %2789 = vmatpush3.msk.msra.mxu1 %vm343_vm0, %v3275_v2  ;;  %v3376_v32 = vld [vmem:[#allocation2 + $0x50] sm:$0xff]  ;;  %v3381_v33 = vld [vmem:[#allocation2 + $0x68] sm:$0xff] }
  0x22   : > { %2893 = vmatpush3.msk.msra.mxu0 %vm343_vm0, %v3280_v3  ;;  %2767 = vmatprep.mubr.msk.f32.mxu1 %vm197_vm1, %v1149_v26  ;;  %v3393_v34 = vld [vmem:[#allocation2 + $0x70] sm:$0xff]  ;;  %v3395_v35 = vld [vmem:[#allocation2 + $0x88] sm:$0xff] }
  0x23   : > { %2871 = vmatprep.mubr.msk.f32.mxu0 %vm197_vm1, %v3360_v29  ;;  %2918 = vmatprep.subr.msk.mxu0 %vm343_vm0, %v2551_v30  ;;  %v3405_v36 = vld [vmem:[#allocation2 + $0x90] sm:$0xff]  ;;  %v3419_v39 = vld [vmem:[#allocation2 + $0xa8] sm:$0xff] }
  0x24   : > { %2814 = vmatprep.subr.msk.mxu1 %vm343_vm0, %v3370_v31  ;;  %2768 = vmatmul.mubr.msk.f32.gmra.mrb[2].mxu1 %vm197_vm1, %v1150_v28  ;;  %v3407_v37 = vld [vmem:[#allocation2 + $0x29] sm:$0xff]  ;;  %v3417_v38 = vld [vmem:[#allocation2 + $0x31] sm:$0xff] }
  0x25   : > { %2872 = vmatmul.mubr.msk.f32.gmra.mrb[2].mxu0 %vm197_vm1, %v3376_v32  ;;  %2770 = vmatprep.mubr.msk.f32.mxu1 %vm197_vm1, %v3360_v29  ;;  %v3421_v40 = vld [vmem:[#allocation2 + $0x49] sm:$0xff]  ;;  %v3437_v43 = vld [vmem:[#allocation2 + $0x51] sm:$0xff] }
  0x26   : > { %2874 = vmatprep.mubr.msk.f32.mxu0 %vm197_vm1, %v3381_v33  ;;  %v3435_v42 = vld [vmem:[#allocation2 + $0xb0] sm:$0xff]  ;;  %v3441_v44 = vld [vmem:[#allocation2 + $0xc8] sm:$0xff] }
  0x27   : > { %v3443_v45 = vld [vmem:[#allocation2 + $0x69] sm:$0xff]  ;;  %v3457_v47 = vld [vmem:[#allocation2 + $0x71] sm:$0xff] }
  0x28   : > { %2771 = vmatmul.mubr.msk.f32.gmra.mrb[4].mxu1 %vm197_vm1, %v3376_v32  ;;  %v3455_v46 = vld [vmem:[#allocation2 + $0xd0] sm:$0xff]  ;;  %v3459_v48 = vld [vmem:[#allocation2 + $0xe8] sm:$0xff] }
  0x29   : > { %2875 = vmatmul.mubr.msk.f32.gmra.mrb[4].mxu0 %vm197_vm1, %v3393_v34  ;;  %2773 = vmatprep.mubr.msk.f32.mxu1 %vm197_vm1, %v3381_v33  ;;  %v3461_v49 = vld [vmem:[#allocation2 + $0x89] sm:$0xff]  ;;  %v3473_v51 = vld [vmem:[#allocation2 + $0x91] sm:$0xff] }
  0x2a   : > { %2877 = vmatprep.mubr.msk.f32.mxu0 %vm197_vm1, %v3395_v35  ;;  %v3471_v50 = vld [vmem:[#allocation2 + $0xf0] sm:$0xff]  ;;  %v260_v52 = vld [vmem:[#allocation2 + $0x7] sm:$0xff] }
  0x2b   : > { %v3475_v53 = vld [vmem:[#allocation2 + $0xa9] sm:$0xff]  ;;  %v3484_v55 = vld [vmem:[#allocation2 + $0xb1] sm:$0xff] }
  0x2c   : > { %2774 = vmatmul.mubr.msk.f32.gmra.mrb[6].mxu1 %vm197_vm1, %v3393_v34  ;;  %v261_v54 = vld [vmem:[#allocation2 + $0xf] sm:$0xff]  ;;  %v3486_v56 = vld [vmem:[#allocation2 + $0x27] sm:$0xff] }
  0x2d   : > { %2878 = vmatmul.mubr.msk.f32.gmra.mrb[6].mxu0 %vm197_vm1, %v3405_v36  ;;  %2776 = vmatprep.mubr.msk.f32.mxu1 %vm197_vm1, %v3395_v35  ;;  %v3488_v57 = vld [vmem:[#allocation2 + $0xc9] sm:$0xff]  ;;  %v3502_v60 = vld [vmem:[#allocation2 + $0xd1] sm:$0xff] }
  0x2e   : > { %2894 = vmatprep.mubr.msk.f32.mxu0 %vm197_vm1, %v3407_v37  ;;  %v3500_v59 = vld [vmem:[#allocation2 + $0x2f] sm:$0xff]  ;;  %v3506_v61 = vld [vmem:[#allocation2 + $0x47] sm:$0xff] }
  0x2f   : > { %v3508_v62 = vld [vmem:[#allocation2 + $0xe9] sm:$0xff]  ;;  %v3521_v0 = vld [vmem:[#allocation2 + $0xf1] sm:$0xff] }
  0x30   : > { %2777 = vmatmul.mubr.msk.f32.gmra.mrb[8].mxu1 %vm197_vm1, %v3405_v36  ;;  %v3519_v63 = vld [vmem:[#allocation2 + $0x4f] sm:$0xff]  ;;  %v3523_v2 = vld [vmem:[#allocation2 + $0x67] sm:$0xff] }
  0x31   : > { %2895 = vmatmul.mubr.msk.f32.vlgmr.msra.gmra.mrb[0].mxu0 %vm197_vm1, %v3417_v38  ;;  %2779 = vmatprep.mubr.msk.f32.mxu1 %vm197_vm1, %v3419_v39  ;;  %v3525_v3 = vld [vmem:[#allocation2 + $0x109] sm:$0xff]  ;;  %v3537_v5 = vld [vmem:[#allocation2 + $0x111] sm:$0xff] }
  0x32   : > { %2919 = vmatpush3.msk.msra.mxu0 %vm343_vm0, %v2551_v30  ;;  %2897 = vmatprep.mubr.msk.f32.mxu0 %vm197_vm1, %v3421_v40  ;;  %v3535_v4 = vld [vmem:[#allocation2 + $0x6f] sm:$0xff]  ;;  %v3539_v6 = vld [vmem:[#allocation2 + $0x87] sm:$0xff] }
  0x33   : > { %2944 = vmatprep.subr.msk.mxu0 %vm343_vm0, %v3426_v41  ;;  %v3549_v7 = vld [vmem:[#allocation2 + $0x8f] sm:$0xff]  ;;  %v3551_v8 = vld [vmem:[#allocation2 + $0xa7] sm:$0xff] }
  0x34   : > { %2780 = vmatmul.mubr.msk.f32.gmra.mrb[10].mxu1 %vm197_vm1, %v3435_v42  ;;  %v3564_v10 = vld [vmem:[#allocation2 + $0xaf] sm:$0xff]  ;;  %v3568_v11 = vld [vmem:[#allocation2 + $0xc7] sm:$0xff] }
  0x35   : > { %2898 = vmatmul.mubr.msk.f32.gmra.mrb[2].mxu0 %vm197_vm1, %v3437_v43  ;;  %2782 = vmatprep.mubr.msk.f32.mxu1 %vm197_vm1, %v3441_v44  ;;  %v3579_v12 = vld [vmem:[#allocation2 + $0xcf] sm:$0xff]  ;;  %v3581_v13 = vld [vmem:[#allocation2 + $0xe7] sm:$0xff] }
  0x36   : > { %2900 = vmatprep.mubr.msk.f32.mxu0 %vm197_vm1, %v3443_v45  ;;  %v3591_v14 = vld [vmem:[#allocation2 + $0xef] sm:$0xff]  ;;  %v3608_v17 = vld [vmem:[#allocation2 + $0x107] sm:$0xff] }
  0x37   : > { %v688_v15 = vld [vmem:[#allocation2 + $0x9] sm:$0xff]  ;;  %v689_v16 = vld [vmem:[#allocation2 + $0x11] sm:$0xff] }
  0x38   : > { %2783 = vmatmul.mubr.msk.f32.gmra.mrb[12].mxu1 %vm197_vm1, %v3455_v46  ;;  %v1623_v18 = vld [vmem:[#allocation2 + $0x10f] sm:$0xff]  ;;  %v1624_v19 = vld [vmem:[#allocation2 + $0x127] sm:$0xff] }
  0x39   : > { %2901 = vmatmul.mubr.msk.f32.gmra.mrb[4].mxu0 %vm197_vm1, %v3457_v47  ;;  %2785 = vmatprep.mubr.msk.f32.mxu1 %vm197_vm1, %v3459_v48  ;;  %v1625_v20 = vld [vmem:[#allocation2 + $0x12f] sm:$0xff] }
  0x3a   : > { %2903 = vmatprep.mubr.msk.f32.mxu0 %vm197_vm1, %v3461_v49  ;;  %v1852_v21 = vld [vmem:[#allocation2 + $0x108] sm:$0xff]  ;;  %v1853_v22 = vld [vmem:[#allocation2 + $0x110] sm:$0xff] }
  0x3b   : > { %v1855_v23 = vld [vmem:[#allocation2 + $0x130] sm:$0xff] }
  0x3c   : > { %2786 = vmatmul.mubr.msk.f32.gmra.mrb[14].mxu1 %vm197_vm1, %v3471_v50  ;;  %v2084_v24 = vld [vmem:[#allocation2 + $0x129] sm:$0xff]  ;;  %v2085_v25 = vld [vmem:[#allocation2 + $0x131] sm:$0xff] }
  0x3d   : > { %2904 = vmatmul.mubr.msk.f32.gmra.mrb[6].mxu0 %vm197_vm1, %v3473_v51  ;;  %2790 = vmatprep.mubr.msk.f32.mxu1 %vm197_vm1, %v260_v52 }
  0x3e   : > { %2906 = vmatprep.mubr.msk.f32.mxu0 %vm197_vm1, %v3475_v53 }
  0x40   : > { %2791 = vmatmul.mubr.msk.f32.vlgmr.msra.gmra.mrb[0].mxu1 %vm197_vm1, %v261_v54 }
  0x41   : > { %2907 = vmatmul.mubr.msk.f32.gmra.mrb[8].mxu0 %vm197_vm1, %v3484_v55  ;;  %2815 = vmatpush3.msk.msra.mxu1 %vm343_vm0, %v3370_v31 }
  0x42   : > { %2793 = vmatprep.mubr.msk.f32.mxu1 %vm197_vm1, %v3486_v56  ;;  %2909 = vmatprep.mubr.msk.f32.mxu0 %vm197_vm1, %v3488_v57 }
  0x43   : > { %2840 = vmatprep.subr.msk.mxu1 %vm343_vm0, %v2497_v58 }
  0x44   : > { %2794 = vmatmul.mubr.msk.f32.gmra.mrb[2].mxu1 %vm197_vm1, %v3500_v59 }
  0x45   : > { %2910 = vmatmul.mubr.msk.f32.gmra.mrb[10].mxu0 %vm197_vm1, %v3502_v60  ;;  %2796 = vmatprep.mubr.msk.f32.mxu1 %vm197_vm1, %v3506_v61 }
  0x46   : > { %2912 = vmatprep.mubr.msk.f32.mxu0 %vm197_vm1, %v3508_v62 }
  0x48   : > { %2797 = vmatmul.mubr.msk.f32.gmra.mrb[4].mxu1 %vm197_vm1, %v3519_v63 }
  0x49   : > { %2913 = vmatmul.mubr.msk.f32.gmra.mrb[12].mxu0 %vm197_vm1, %v3521_v0  ;;  %2799 = vmatprep.mubr.msk.f32.mxu1 %vm197_vm1, %v3523_v2 }
  0x4a   : > { %2915 = vmatprep.mubr.msk.f32.mxu0 %vm197_vm1, %v3525_v3 }
  0x4c   : > { %2800 = vmatmul.mubr.msk.f32.gmra.mrb[6].mxu1 %vm197_vm1, %v3535_v4 }
  0x4d   : > { %2916 = vmatmul.mubr.msk.f32.gmra.mrb[14].mxu0 %vm197_vm1, %v3537_v5  ;;  %2802 = vmatprep.mubr.msk.f32.mxu1 %vm197_vm1, %v3539_v6 }
  0x4e   : > { %2920 = vmatprep.mubr.msk.f32.mxu0 %vm197_vm1, %v3506_v61 }
  0x50   : > { %2803 = vmatmul.mubr.msk.f32.gmra.mrb[8].mxu1 %vm197_vm1, %v3549_v7 }
  0x51   : > { %2921 = vmatmul.mubr.msk.f32.vlgmr.msra.gmra.mrb[0].mxu0 %vm197_vm1, %v3519_v63  ;;  %2805 = vmatprep.mubr.msk.f32.mxu1 %vm197_vm1, %v3551_v8 }
  0x52   : > { %2945 = vmatpush3.msk.msra.mxu0 %vm343_vm0, %v3426_v41  ;;  %2923 = vmatprep.mubr.msk.f32.mxu0 %vm197_vm1, %v3523_v2 }
  0x53   : > { %2970 = vmatprep.subr.msk.mxu0 %vm343_vm0, %v2587_v9 }
  0x54   : > { %2806 = vmatmul.mubr.msk.f32.gmra.mrb[10].mxu1 %vm197_vm1, %v3564_v10 }
  0x55   : > { %2924 = vmatmul.mubr.msk.f32.gmra.mrb[2].mxu0 %vm197_vm1, %v3535_v4  ;;  %2808 = vmatprep.mubr.msk.f32.mxu1 %vm197_vm1, %v3568_v11 }
  0x56   : > { %2926 = vmatprep.mubr.msk.f32.mxu0 %vm197_vm1, %v3539_v6 }
  0x58   : > { %2809 = vmatmul.mubr.msk.f32.gmra.mrb[12].mxu1 %vm197_vm1, %v3579_v12 }
  0x59   : > { %2927 = vmatmul.mubr.msk.f32.gmra.mrb[4].mxu0 %vm197_vm1, %v3549_v7  ;;  %2811 = vmatprep.mubr.msk.f32.mxu1 %vm197_vm1, %v3581_v13 }
  0x5a   : > { %2929 = vmatprep.mubr.msk.f32.mxu0 %vm197_vm1, %v3551_v8 }
  0x5c   : > { %2812 = vmatmul.mubr.msk.f32.gmra.mrb[14].mxu1 %vm197_vm1, %v3591_v14 }
  0x5d   : > { %2930 = vmatmul.mubr.msk.f32.gmra.mrb[6].mxu0 %vm197_vm1, %v3564_v10  ;;  %2816 = vmatprep.mubr.msk.f32.mxu1 %vm197_vm1, %v688_v15 }
  0x5e   : > { %2932 = vmatprep.mubr.msk.f32.mxu0 %vm197_vm1, %v3568_v11 }
  0x60   : > { %2817 = vmatmul.mubr.msk.f32.vlgmr.msra.gmra.mrb[0].mxu1 %vm197_vm1, %v689_v16 }
  0x61   : > { %2933 = vmatmul.mubr.msk.f32.gmra.mrb[8].mxu0 %vm197_vm1, %v3579_v12  ;;  %2841 = vmatpush3.msk.msra.mxu1 %vm343_vm0, %v2497_v58 }
  0x62   : > { %2819 = vmatprep.mubr.msk.f32.mxu1 %vm197_vm1, %v3407_v37  ;;  %2935 = vmatprep.mubr.msk.f32.mxu0 %vm197_vm1, %v3581_v13 }
  0x63   : > { %2996 = vmatprep.subr.msk.mxu1 %vm343_vm0, %v3267_v1 }
  0x64   : > { %2820 = vmatmul.mubr.msk.f32.gmra.mrb[2].mxu1 %vm197_vm1, %v3417_v38 }
  0x65   : > { %2936 = vmatmul.mubr.msk.f32.gmra.mrb[10].mxu0 %vm197_vm1, %v3591_v14  ;;  %2822 = vmatprep.mubr.msk.f32.mxu1 %vm197_vm1, %v3421_v40 }
  0x66   : > { %2938 = vmatprep.mubr.msk.f32.mxu0 %vm197_vm1, %v3608_v17 }
  0x68   : > { %2823 = vmatmul.mubr.msk.f32.gmra.mrb[4].mxu1 %vm197_vm1, %v3437_v43 }
  0x69   : > { %2939 = vmatmul.mubr.msk.f32.gmra.mrb[12].mxu0 %vm197_vm1, %v1623_v18  ;;  %2825 = vmatprep.mubr.msk.f32.mxu1 %vm197_vm1, %v3443_v45 }
  0x6a   : > { %2941 = vmatprep.mubr.msk.f32.mxu0 %vm197_vm1, %v1624_v19 }
  0x6c   : > { %2826 = vmatmul.mubr.msk.f32.gmra.mrb[6].mxu1 %vm197_vm1, %v3457_v47 }
  0x6d   : > { %2942 = vmatmul.mubr.msk.f32.gmra.mrb[14].mxu0 %vm197_vm1, %v1625_v20  ;;  %2828 = vmatprep.mubr.msk.f32.mxu1 %vm197_vm1, %v3461_v49 }
  0x6e   : > { %2946 = vmatprep.mubr.msk.f32.mxu0 %vm197_vm1, %v3360_v29 }
  0x70   : > { %2829 = vmatmul.mubr.msk.f32.gmra.mrb[8].mxu1 %vm197_vm1, %v3473_v51 }
  0x71   : > { %2947 = vmatmul.mubr.msk.f32.vlgmr.msra.gmra.mrb[0].mxu0 %vm197_vm1, %v3376_v32  ;;  %2831 = vmatprep.mubr.msk.f32.mxu1 %vm197_vm1, %v3475_v53 }
  0x72   : > { %2971 = vmatpush3.msk.msra.mxu0 %vm343_vm0, %v2587_v9  ;;  %2949 = vmatprep.mubr.msk.f32.mxu0 %vm197_vm1, %v3381_v33 }
  0x74   : > { %2832 = vmatmul.mubr.msk.f32.gmra.mrb[10].mxu1 %vm197_vm1, %v3484_v55 }
  0x75   : > { %2950 = vmatmul.mubr.msk.f32.gmra.mrb[2].mxu0 %vm197_vm1, %v3393_v34  ;;  %2834 = vmatprep.mubr.msk.f32.mxu1 %vm197_vm1, %v3488_v57 }
  0x76   : > { %2952 = vmatprep.mubr.msk.f32.mxu0 %vm197_vm1, %v3395_v35  ;;  %v3756_v35 = vld [vmem:[%s3828_s2] ss:$0 sm:$0xff] }
  0x78   : > { %2835 = vmatmul.mubr.msk.f32.gmra.mrb[12].mxu1 %vm197_vm1, %v3502_v60 }
  0x79   : > { %2953 = vmatmul.mubr.msk.f32.gmra.mrb[4].mxu0 %vm197_vm1, %v3405_v36  ;;  %2837 = vmatprep.mubr.msk.f32.mxu1 %vm197_vm1, %v3508_v62 }
  0x7a   : > { %2955 = vmatprep.mubr.msk.f32.mxu0 %vm197_vm1, %v3419_v39 }
  0x7c   : > { %2838 = vmatmul.mubr.msk.f32.gmra.mrb[14].mxu1 %vm197_vm1, %v3521_v0 }
  0x7d   : > { %2956 = vmatmul.mubr.msk.f32.gmra.mrb[6].mxu0 %vm197_vm1, %v3435_v42  ;;  %2842 = vmatprep.mubr.msk.f32.mxu1 %vm197_vm1, %v3486_v56 }
  0x7e   : > { %2958 = vmatprep.mubr.msk.f32.mxu0 %vm197_vm1, %v3441_v44 }
  0x80   : > { %2843 = vmatmul.mubr.msk.f32.vlgmr.msra.gmra.mrb[0].mxu1 %vm197_vm1, %v3500_v59 }
  0x81   : > { %2959 = vmatmul.mubr.msk.f32.gmra.mrb[8].mxu0 %vm197_vm1, %v3455_v46  ;;  %2997 = vmatpush3.msk.msra.mxu1 %vm343_vm0, %v3267_v1  ;;  %v1854_v1 = vld [vmem:[#allocation2 + $0x128] sm:$0xff] }
  0x82   : > { %2845 = vmatprep.mubr.msk.f32.mxu1 %vm197_vm1, %v3506_v61  ;;  %2961 = vmatprep.mubr.msk.f32.mxu0 %vm197_vm1, %v3459_v48 }
  0x84   : > { %2846 = vmatmul.mubr.msk.f32.gmra.mrb[2].mxu1 %vm197_vm1, %v3519_v63 }
  0x85   : > { %2962 = vmatmul.mubr.msk.f32.gmra.mrb[10].mxu0 %vm197_vm1, %v3471_v50  ;;  %2848 = vmatprep.mubr.msk.f32.mxu1 %vm197_vm1, %v3523_v2 }
  0x86   : > { %2964 = vmatprep.mubr.msk.f32.mxu0 %vm197_vm1, %v1852_v21 }
  0x88   : > { %2849 = vmatmul.mubr.msk.f32.gmra.mrb[4].mxu1 %vm197_vm1, %v3535_v4 }
  0x89   : > { %2965 = vmatmul.mubr.msk.f32.gmra.mrb[12].mxu0 %vm197_vm1, %v1853_v22  ;;  %2851 = vmatprep.mubr.msk.f32.mxu1 %vm197_vm1, %v3539_v6 }
  0x8a   : > { %2967 = vmatprep.mubr.msk.f32.mxu0 %vm197_vm1, %v1854_v1 }
  0x8c   : > { %2852 = vmatmul.mubr.msk.f32.gmra.mrb[6].mxu1 %vm197_vm1, %v3549_v7 }
  0x8d   : > { %2968 = vmatmul.mubr.msk.f32.gmra.mrb[14].mxu0 %vm197_vm1, %v1855_v23  ;;  %2854 = vmatprep.mubr.msk.f32.mxu1 %vm197_vm1, %v3551_v8 }
  0x8e   : > { %2972 = vmatprep.mubr.msk.f32.mxu0 %vm197_vm1, %v3421_v40 }
  0x90   : > { %2855 = vmatmul.mubr.msk.f32.gmra.mrb[8].mxu1 %vm197_vm1, %v3564_v10 }
  0x91   : > { %2973 = vmatmul.mubr.msk.f32.vlgmr.msra.gmra.mrb[0].mxu0 %vm197_vm1, %v3437_v43  ;;  %2857 = vmatprep.mubr.msk.f32.mxu1 %vm197_vm1, %v3568_v11 }
  0x92   : > { %2975 = vmatprep.mubr.msk.f32.mxu0 %vm197_vm1, %v3443_v45 }
  0x94   : > { %2858 = vmatmul.mubr.msk.f32.gmra.mrb[10].mxu1 %vm197_vm1, %v3579_v12 }
  0x95   : > { %2976 = vmatmul.mubr.msk.f32.gmra.mrb[2].mxu0 %vm197_vm1, %v3457_v47  ;;  %2860 = vmatprep.mubr.msk.f32.mxu1 %vm197_vm1, %v3581_v13 }
  0x96   : > { %2978 = vmatprep.mubr.msk.f32.mxu0 %vm197_vm1, %v3461_v49 }
  0x98   : > { %2861 = vmatmul.mubr.msk.f32.gmra.mrb[12].mxu1 %vm197_vm1, %v3591_v14 }
  0x99   : > { %2979 = vmatmul.mubr.msk.f32.gmra.mrb[4].mxu0 %vm197_vm1, %v3473_v51  ;;  %2863 = vmatprep.mubr.msk.f32.mxu1 %vm197_vm1, %v3608_v17 }
  0x9a   : > { %2981 = vmatprep.mubr.msk.f32.mxu0 %vm197_vm1, %v3475_v53 }
  0x9c   : > { %2864 = vmatmul.mubr.msk.f32.gmra.mrb[14].mxu1 %vm197_vm1, %v1623_v18 }
  0x9d   : > { %2982 = vmatmul.mubr.msk.f32.gmra.mrb[6].mxu0 %vm197_vm1, %v3484_v55  ;;  %2880 = vmatprep.mubr.msk.f32.mxu1 %vm197_vm1, %v3419_v39 }
  0x9e   : > { %2984 = vmatprep.mubr.msk.f32.mxu0 %vm197_vm1, %v3488_v57 }
  0xa0   : > { %2881 = vmatmul.mubr.msk.f32.vlgmr.msra.gmra.mrb[8].mxu1 %vm197_vm1, %v3435_v42 }
  0xa1   : > { %2985 = vmatmul.mubr.msk.f32.gmra.mrb[8].mxu0 %vm197_vm1, %v3502_v60  ;;  %2883 = vmatprep.mubr.msk.f32.mxu1 %vm197_vm1, %v3441_v44 }
  0xa2   : > { %2987 = vmatprep.mubr.msk.f32.mxu0 %vm197_vm1, %v3508_v62 }
  0xa4   : > { %2884 = vmatmul.mubr.msk.f32.gmra.mrb[10].mxu1 %vm197_vm1, %v3455_v46 }
  0xa5   : > { %2988 = vmatmul.mubr.msk.f32.gmra.mrb[10].mxu0 %vm197_vm1, %v3521_v0  ;;  %2886 = vmatprep.mubr.msk.f32.mxu1 %vm197_vm1, %v3459_v48 }
  0xa6   : > { %2990 = vmatprep.mubr.msk.f32.mxu0 %vm197_vm1, %v3525_v3 }
  0xa8   : > { %2887 = vmatmul.mubr.msk.f32.gmra.mrb[12].mxu1 %vm197_vm1, %v3471_v50 }
  0xa9   : > { %2991 = vmatmul.mubr.msk.f32.gmra.mrb[12].mxu0 %vm197_vm1, %v3537_v5  ;;  %2889 = vmatprep.mubr.msk.f32.mxu1 %vm197_vm1, %v1852_v21 }
  0xaa   : > { %2993 = vmatprep.mubr.msk.f32.mxu0 %vm197_vm1, %v2084_v24 }
  0xac   : > { %2890 = vmatmul.mubr.msk.f32.gmra.mrb[14].mxu1 %vm197_vm1, %v1853_v22 }
  0xad   : > { %2994 = vmatmul.mubr.msk.f32.gmra.mrb[14].mxu0 %vm197_vm1, %v2085_v25 }
 0x153   : > { %v2844_v26 = vpop.f32.mrb[0].mxu1 }
 0x154   : > { %v1054_v27 = vpop.f32.mrb[1].mxu1 }
 0x157   : > { %v2847_v28 = vpop.f32.mrb[2].mxu1 }
 0x158   : > { %v1064_v29 = vpop.f32.mrb[3].mxu1 }
 0x15b   : > { %v2850_v30 = vpop.f32.mrb[4].mxu1 }
 0x15c   : > { %v1074_v31 = vpop.f32.mrb[5].mxu1 }
 0x15f   : > { %v2853_v32 = vpop.f32.mrb[6].mxu1 }
 0x160   : > { %v1084_v33 = vpop.f32.mrb[7].mxu1 }
 0x164   : > { %v2974_v34 = vpop.f32.mrb[0].mxu0 }
 0x165   : > { %v2998_v36 = vadd.f32 %v2974_v34, %v2844_v26  ;;  %v2205_v37 = vpop.f32.mrb[1].mxu0 }
 0x166   : > { %v2999_v38 = vadd.f32 %v2205_v37, %v1054_v27 }
 0x167   : > { %v2308_v39 = vadd.f32 %v2998_v36, %v3756_v35 }
 0x168   : > { %v2307_v40 = vadd.f32 %v2999_v38, %v3756_v35  ;;  %v2977_v41 = vpop.f32.mrb[2].mxu0 }
 0x169   : > { %2325 = vst.msk [vmem:[%s3761_s4 + $0x8] sm:$0xff] %vm2323_vm2, %v2308_v39  ;;  %v3000_v42 = vadd.f32 %v2977_v41, %v2847_v28  ;;  %v2215_v43 = vpop.f32.mrb[3].mxu0 }
 0x16a   : > { %2324 = vst.msk [vmem:[%s3761_s4] sm:$0xff] %vm2323_vm2, %v2307_v40  ;;  %v3001_v44 = vadd.f32 %v2215_v43, %v1064_v29 }
 0x16b   : > { %v2310_v45 = vadd.f32 %v3000_v42, %v3756_v35 }
 0x16c   : > { %v2309_v46 = vadd.f32 %v3001_v44, %v3756_v35  ;;  %v2980_v47 = vpop.f32.mrb[4].mxu0 }
 0x16d   : > { %2327 = vst.msk [vmem:[%s3761_s4 + $0x18] sm:$0xff] %vm2323_vm2, %v2310_v45  ;;  %v3002_v48 = vadd.f32 %v2980_v47, %v2850_v30  ;;  %v2225_v49 = vpop.f32.mrb[5].mxu0 }
 0x16e   : > { %2326 = vst.msk [vmem:[%s3761_s4 + $0x10] sm:$0xff] %vm2323_vm2, %v2309_v46  ;;  %v3003_v50 = vadd.f32 %v2225_v49, %v1074_v31 }
 0x16f   : > { %v2312_v51 = vadd.f32 %v3002_v48, %v3756_v35 }
 0x170   : > { %v2311_v52 = vadd.f32 %v3003_v50, %v3756_v35  ;;  %v2983_v53 = vpop.f32.mrb[6].mxu0 }
 0x171   : > { %2329 = vst.msk [vmem:[%s3761_s4 + $0x28] sm:$0xff] %vm2323_vm2, %v2312_v51  ;;  %v3004_v54 = vadd.f32 %v2983_v53, %v2853_v32  ;;  %v2235_v55 = vpop.f32.mrb[7].mxu0 }
 0x172   : > { %2328 = vst.msk [vmem:[%s3761_s4 + $0x20] sm:$0xff] %vm2323_vm2, %v2311_v52  ;;  %v3005_v56 = vadd.f32 %v2235_v55, %v1084_v33 }
 0x173   : > { %v2314_v57 = vadd.f32 %v3004_v54, %v3756_v35  ;;  %v2882_v59 = vpop.f32.mrb[8].mxu1 }
 0x174   : > { %v2313_v58 = vadd.f32 %v3005_v56, %v3756_v35  ;;  %v2986_v60 = vpop.f32.mrb[8].mxu0  ;;  %v1324_v62 = vpop.f32.mrb[9].mxu1 }
 0x175   : > { %2331 = vst.msk [vmem:[%s3761_s4 + $0x38] sm:$0xff] %vm2323_vm2, %v2314_v57  ;;  %v3006_v61 = vadd.f32 %v2986_v60, %v2882_v59  ;;  %v2245_v63 = vpop.f32.mrb[9].mxu0 }
 0x176   : > { %2330 = vst.msk [vmem:[%s3761_s4 + $0x30] sm:$0xff] %vm2323_vm2, %v2313_v58  ;;  %v3007_v0 = vadd.f32 %v2245_v63, %v1324_v62 }
 0x177   : > { %v2316_v2 = vadd.f32 %v3006_v61, %v3756_v35  ;;  %v2885_v4 = vpop.f32.mrb[10].mxu1 }
 0x178   : > { %v2315_v3 = vadd.f32 %v3007_v0, %v3756_v35  ;;  %v2989_v5 = vpop.f32.mrb[10].mxu0  ;;  %v1334_v7 = vpop.f32.mrb[11].mxu1 }
 0x179   : > { %2333 = vst.msk [vmem:[%s3761_s4 + $0x48] sm:$0xff] %vm2323_vm2, %v2316_v2  ;;  %v3008_v6 = vadd.f32 %v2989_v5, %v2885_v4  ;;  %v2255_v8 = vpop.f32.mrb[11].mxu0 }
 0x17a   : > { %2332 = vst.msk [vmem:[%s3761_s4 + $0x40] sm:$0xff] %vm2323_vm2, %v2315_v3  ;;  %v3009_v9 = vadd.f32 %v2255_v8, %v1334_v7 }
 0x17b   : > { %v2318_v10 = vadd.f32 %v3008_v6, %v3756_v35  ;;  %v2888_v12 = vpop.f32.mrb[12].mxu1 }
 0x17c   : > { %v2317_v11 = vadd.f32 %v3009_v9, %v3756_v35  ;;  %v2992_v13 = vpop.f32.mrb[12].mxu0  ;;  %v1344_v15 = vpop.f32.mrb[13].mxu1 }
 0x17d   : > { %2335 = vst.msk [vmem:[%s3761_s4 + $0x58] sm:$0xff] %vm2323_vm2, %v2318_v10  ;;  %v3010_v14 = vadd.f32 %v2992_v13, %v2888_v12  ;;  %v2265_v16 = vpop.f32.mrb[13].mxu0 }
 0x17e   : > { %2334 = vst.msk [vmem:[%s3761_s4 + $0x50] sm:$0xff] %vm2323_vm2, %v2317_v11  ;;  %v3011_v17 = vadd.f32 %v2265_v16, %v1344_v15 }
 0x17f   : > { %v2320_v18 = vadd.f32 %v3010_v14, %v3756_v35  ;;  %v2891_v20 = vpop.f32.mrb[14].mxu1 }
 0x180   : > { %v2319_v19 = vadd.f32 %v3011_v17, %v3756_v35  ;;  %v2995_v21 = vpop.f32.mrb[14].mxu0  ;;  %v1354_v1 = vpop.f32.mrb[15].mxu1 }
 0x181   : > { %2337 = vst.msk [vmem:[%s3761_s4 + $0x68] sm:$0xff] %vm2323_vm2, %v2320_v18  ;;  %v3012_v22 = vadd.f32 %v2995_v21, %v2891_v20  ;;  %v2275_v23 = vpop.f32.mrb[15].mxu0 }
 0x182   : > { %2336 = vst.msk [vmem:[%s3761_s4 + $0x60] sm:$0xff] %vm2323_vm2, %v2319_v19  ;;  %v3013_v24 = vadd.f32 %v2275_v23, %v1354_v1 }
 0x183   : > { %v2322_v25 = vadd.f32 %v3012_v22, %v3756_v35 }
 0x184   : > { %v2321_v26 = vadd.f32 %v3013_v24, %v3756_v35 }
 0x185   : > { %2339 = vst.msk [vmem:[%s3761_s4 + $0x78] sm:$0xff] %vm2323_vm2, %v2322_v25 }
 0x186   : > { %2338 = vst.msk [vmem:[%s3761_s4 + $0x70] sm:$0xff] %vm2323_vm2, %v2321_v26 }
 0x187 PF: > { %s13_s16 = sadd.s32 1, %s3206_s16   ;;  %s3830_s12 = smov %s3198_s14 }
 0x188   : > { %p10_p7 = scmp.ge.s32.totalorder %s13_s16, 6   ;;  %s3831_s13 = smov %s3202_s15 }
 0x189   : > { %s3832_s14 = smov %s3835_s17  ;;  %s3833_s15 = smov %s3839_s18 }
 0x18a   :  { %12 = sbr.rel (!%p10_p7) target bundleno = 3 (0x3), region = 73 }

</bundles_post_ra>
